<compile_context>
chip_gen: v7x
topology: tpu7x:2x2x1
jax: 0.10.0
libtpu: 0.0.40
codegen_flags: <defaults>
</compile_context>

<pallas_src>
import jax
import jax.numpy as jnp
from jax.experimental import pallas as pl
from jax.experimental.pallas import tpu as pltpu

LANE = 128          # lane width (last dim tiling)
SUBLANE_BF16 = 16   # bf16 sublane tile (second-minor dim)


def _round_up(x, m):
    return ((x + m - 1) // m) * m


def fused_autoreg_kernel(x_ref, w_ref, out_ref):
    """out = x @ W  (mask, cond-linear and bias all pre-folded into W)."""
    out_ref[...] = jnp.dot(
        x_ref[...], w_ref[...], preferred_element_type=jnp.float32
    ).astype(out_ref.dtype)


def prepare_fused_params(params, trunc, in_action_dim, out_action_dim, state_dim):
    """Hoisted per-parameter-set prep (run once, reuse every forward call).

    Builds the combined, pre-transposed, lane-padded bf16 weight:
        rows [0 : din_t)            = (W_lin * mask).T          (masked linear)
        rows [din_t : din_t + sd)   = tile(W_cond, (trunc, 1)).T (cond linear)
        row  [din_t + sd]           = b_lin + tile(b_cond)       (folded bias)
        remaining rows / cols       = 0  (contribute nothing to the matmul)
    """
    dout_t = trunc * out_action_dim
    din_t = trunc * in_action_dim
    k_bias = din_t + state_dim          # row index of the folded bias
    k_tot = k_bias + 1                  # features + bias column

    w_masked = params["w_lin"][:dout_t, :din_t] * params["mask"][:dout_t, :din_t]
    w_cond_tiled = jnp.tile(params["w_cond"], (trunc, 1))        # (dout_t, state_dim)
    b_comb = params["b_lin"][:dout_t] + jnp.tile(params["b_cond"], (trunc,))

    k_pad = _round_up(k_tot, LANE)
    n_pad = _round_up(dout_t, LANE)

    w_t_pad = jnp.zeros((k_pad, n_pad), jnp.float32)
    w_t_pad = w_t_pad.at[:din_t, :dout_t].set(w_masked.T)
    w_t_pad = w_t_pad.at[din_t:k_bias, :dout_t].set(w_cond_tiled.T)
    w_t_pad = w_t_pad.at[k_bias, :dout_t].set(b_comb)

    # bf16 operands halve the dominant (weight) DMA on v5e/v6e/v7x; the MXU
    # accumulates in f32 (preferred_element_type), so only operand precision
    # drops (verified below with loosened tolerances).
    w_t_pad = w_t_pad.astype(jnp.bfloat16)

    return {"w_t_pad": w_t_pad, "din_t": din_t, "k_bias": k_bias,
            "k_pad": k_pad, "n_pad": n_pad, "dout_t": dout_t}


def autoreg_layer_forward(state, actions, fused):
    """Fused forward.

    state:   (B, state_dim)              or (T, B, state_dim)
    actions: (B, trunc*in_action_dim)    or (T, B, trunc*in_action_dim)

    A leading T ("steps") axis is mapped to the Pallas grid so the combined
    weight is DMA'd once and stays VMEM-resident across all T steps.
    """
    squeeze_t = state.ndim == 2
    if squeeze_t:
        state, actions = state[None], actions[None]
    T, B, _ = state.shape

    k_bias, k_pad = fused["k_bias"], fused["k_pad"]
    n_pad, dout_t = fused["n_pad"], fused["dout_t"]
    b_pad = _round_up(B, SUBLANE_BF16)

    # x = [actions | state | 1 | 0-pad] ; the "1" column activates the folded
    # bias row of W.  This producer is fused into the Pallas operand below.
    ones = jnp.ones((T, B, 1), jnp.float32)
    x = jnp.concatenate([actions, state, ones], axis=-1)          # (T, B, k_bias+1)
    x = jnp.pad(x, ((0, 0), (0, b_pad - B), (0, k_pad - (k_bias + 1))))
    x = x.astype(jnp.bfloat16)

    out_pad = pl.pallas_call(
        fused_autoreg_kernel,
        out_shape=jax.ShapeDtypeStruct((T, b_pad, n_pad), jnp.float32),
        grid=(T,),
        in_specs=[
            # x: one (b_pad, k_pad) tile streamed per grid step.
            pl.BlockSpec((pl.Squeezed(), b_pad, k_pad), lambda t: (t, 0, 0)),
            # W: constant block index across the grid -> DMA'd once, stays
            # VMEM-resident for all T steps.
            pl.BlockSpec((k_pad, n_pad), lambda t: (0, 0)),
        ],
        out_specs=pl.BlockSpec((pl.Squeezed(), b_pad, n_pad), lambda t: (t, 0, 0)),
        compiler_params=pltpu.CompilerParams(
            dimension_semantics=("parallel",),      # v7x: shard T across 2 TCs
            allow_input_fusion=[True, False],       # fuse concat/pad/cast into x
        ),
    )(x, fused["w_t_pad"])

    # Narrowing slice done once here ("end of the network" in this script);
    # padded rows/lanes are exact zeros and never flow further.
    out = out_pad[:, :B, :dout_t]
    return out[0] if squeeze_t else out


def make_params(key, state_dim, in_action_dim, out_action_dim, delay):
    """Deterministic parameter init mirroring the nn.Module __init__ shapes."""
    k1, k2, k3, k4 = jax.random.split(key, 4)
    d_in = in_action_dim * delay
    d_out = out_action_dim * delay

    lim_lin = 1.0 / jnp.sqrt(d_in)
    lim_cond = 1.0 / jnp.sqrt(state_dim)
    w_lin = jax.random.uniform(k1, (d_out, d_in), jnp.float32, -lim_lin, lim_lin)
    b_lin = jax.random.uniform(k2, (d_out,), jnp.float32, -lim_lin, lim_lin)
    w_cond = jax.random.uniform(k3, (out_action_dim, state_dim), jnp.float32,
                                -lim_cond, lim_cond)
    b_cond = jax.random.uniform(k4, (out_action_dim,), jnp.float32,
                                -lim_cond, lim_cond)

    # autoregressive mask: mask[l, j] = j < (1 + l // out_action_dim) * in_action_dim
    rows = jnp.arange(d_out)[:, None]
    cols = jnp.arange(d_in)[None, :]
    mask = (cols < (1 + rows // out_action_dim) * in_action_dim).astype(jnp.float32)

    return {"w_lin": w_lin, "b_lin": b_lin, "mask": mask,
            "w_cond": w_cond, "b_cond": b_cond}


def reference_forward(state, actions, params, in_action_dim, out_action_dim):
    """Pure-JAX f32 reference mirroring the PyTorch forward, for verification."""
    trunc = actions.shape[1] // in_action_dim
    dout_t = trunc * out_action_dim
    din_t = trunc * in_action_dim
    w = params["w_lin"][:dout_t, :din_t] * params["mask"][:dout_t, :din_t]
    out = actions @ w.T + params["b_lin"][:dout_t]
    cond = state @ params["w_cond"].T + params["b_cond"]
    return out + jnp.tile(cond, (1, trunc))


if __name__ == "__main__":
    # small, module-consistent shapes
    state_dim = 32
    in_action_dim = 4
    out_action_dim = 4
    delay = 8
    trunc = 6          # actions cover only the first 6 of 8 delay steps
    B = 2
    T = 4              # demo "steps" axis for the weight-resident grid path

    key = jax.random.PRNGKey(0)
    kp, ks, ka = jax.random.split(key, 3)
    params = make_params(kp, state_dim, in_action_dim, out_action_dim, delay)

    # Hoisted once per parameter set (not per forward call).
    fused = prepare_fused_params(params, trunc, in_action_dim, out_action_dim,
                                 state_dim)

    # --- single-call path (matches the nn.Module signature) ---
    state = jax.random.normal(ks, (B, state_dim), jnp.float32)
    actions = jax.random.normal(ka, (B, trunc * in_action_dim), jnp.float32)

    fwd = jax.jit(lambda s, a: autoreg_layer_forward(s, a, fused))
    out = jax.block_until_ready(fwd(state, actions))

    ref = reference_forward(state, actions, params, in_action_dim, out_action_dim)
    assert out.shape == (B, trunc * out_action_dim), out.shape
    # bf16 operands vs f32 reference: ~0.4% relative operand error expected.
    assert jnp.allclose(out, ref, atol=2e-2, rtol=2e-2), "mismatch vs reference"

    # --- multi-step path: grid=(T,), weight DMA'd once and VMEM-resident ---
    ks2, ka2 = jax.random.split(jax.random.PRNGKey(1), 2)
    state_t = jax.random.normal(ks2, (T, B, state_dim), jnp.float32)
    actions_t = jax.random.normal(ka2, (T, B, trunc * in_action_dim), jnp.float32)

    fwd_steps = jax.jit(lambda s, a: autoreg_layer_forward(s, a, fused))
    out_t = jax.block_until_ready(fwd_steps(state_t, actions_t))

    ref_t = jax.vmap(
        lambda s, a: reference_forward(s, a, params, in_action_dim, out_action_dim)
    )(state_t, actions_t)
    assert out_t.shape == (T, B, trunc * out_action_dim), out_t.shape
    assert jnp.allclose(out_t, ref_t, atol=2e-2, rtol=2e-2), "mismatch (steps) vs reference"

    print("KERNEL_OK")
</pallas_src>

<mosaic_0001>
module attributes {stable_mosaic.version = 11 : i64} {
  func.func @fused_autoreg_kernel(%arg0: i32, %arg1: memref<1x16x128xbf16, #tpu.memory_space<vmem>>, %arg2: memref<128x128xbf16, #tpu.memory_space<vmem>>, %arg3: memref<1x16x128xf32, #tpu.memory_space<vmem>>) attributes {dimension_semantics = [#tpu.dimension_semantics<parallel>], iteration_bounds = array<i64: 1>, scalar_prefetch = 0 : i64, scratch_operands = 0 : i64, tpu.core_type = #tpu.core_type<tc>, window_params = [{transform_indices = @transform_0, window_bounds = array<i64: 1, 16, 128>}, {pipeline_mode = #tpu.pipeline_mode<synchronous>, transform_indices = @transform_1, window_bounds = array<i64: 128, 128>}, {transform_indices = @transform_2, window_bounds = array<i64: 1, 16, 128>}]} {
    %c0 = arith.constant 0 : index
    %c0_0 = arith.constant 0 : index
    %c0_1 = arith.constant 0 : index
    %0 = vector.load %arg1[%c0, %c0_0, %c0_1] : memref<1x16x128xbf16, #tpu.memory_space<vmem>>, vector<1x16x128xbf16>
    %1 = vector.shape_cast %0 : vector<1x16x128xbf16> to vector<16x128xbf16>
    %c0_2 = arith.constant 0 : index
    %c0_3 = arith.constant 0 : index
    %2 = vector.load %arg2[%c0_2, %c0_3] : memref<128x128xbf16, #tpu.memory_space<vmem>>, vector<128x128xbf16>
    %cst = arith.constant dense<0.000000e+00> : vector<16x128xf32>
    %3 = tpu.matmul %1, %2, %cst {dimension_numbers = #tpu.dot_dimension_numbers<[1], [0], [0], [1], [0, 0, 1, 1], [], []>} : vector<16x128xbf16>, vector<128x128xbf16>, vector<16x128xf32> -> vector<16x128xf32>
    %c0_4 = arith.constant 0 : index
    %c0_5 = arith.constant 0 : index
    %c0_6 = arith.constant 0 : index
    %4 = vector.load %arg3[%c0_4, %c0_5, %c0_6] : memref<1x16x128xf32, #tpu.memory_space<vmem>>, vector<1x16x128xf32>
    %5 = vector.shape_cast %4 : vector<1x16x128xf32> to vector<16x128xf32>
    %6 = vector.shape_cast %3 : vector<16x128xf32> to vector<1x16x128xf32>
    tpu.vector_store %arg3[%c0_4, %c0_5, %c0_6], %6 {strides = array<i32>} : memref<1x16x128xf32, #tpu.memory_space<vmem>>, vector<1x16x128xf32>,
    return
  }
  func.func @transform_0(%arg0: i32) -> (i32, i32, i32) {
    %c0_i32 = arith.constant 0 : i32
    %c0_i32_0 = arith.constant 0 : i32
    %c0_i32_1 = arith.constant 0 : i32
    return %arg0, %c0_i32, %c0_i32_0 : i32, i32, i32
  }
  func.func @transform_1(%arg0: i32) -> (i32, i32) {
    %c0_i32 = arith.constant 0 : i32
    %c0_i32_0 = arith.constant 0 : i32
    %c0_i32_1 = arith.constant 0 : i32
    return %c0_i32, %c0_i32_0 : i32, i32
  }
  func.func @transform_2(%arg0: i32) -> (i32, i32, i32) {
    %c0_i32 = arith.constant 0 : i32
    %c0_i32_0 = arith.constant 0 : i32
    %c0_i32_1 = arith.constant 0 : i32
    return %arg0, %c0_i32, %c0_i32_0 : i32, i32, i32
  }
}

</mosaic_0001>

<bundles_post_ra>
// kernel: _lambda_.2
= control target key start
LH: loop header
LB: loop body
LE: loop exit
PB: predicated region body
PF: predicated region fallthrough
CT: control target
= control target key end

     0   :  { %s233_s0 = inlined_call_operand.hbm [shape: bf16[128,128], index: 0, kind: input, shape index: {}]   ;;  %s234_s1 = inlined_call_operand.vmem [shape: bf16[1,2,57], index: 1, kind: input, shape index: {}]   ;;  %s235_s2 = inlined_call_operand.<no memory space> [shape: bf16[], index: 2, kind: input, shape index: {}]   ;;  %s236_s3 = inlined_call_operand.vmem [shape: f32[1,16,128], index: 3, kind: output, shape index: {}]  }
   0x1   :  { %v8_v0 = vstv %s235_s2 }
   0x2   :  { %v9_v1 = vunpack.i.l.bf16 %v8_v0 }
   0x3   :  { %13 = vsyncpa [#allocation8], 0  ;;  %s184_s14 = smov [#allocation7]   ;;  %s160_s18 = scalar_lea.hbm %s233_s0, 1024 }
   0x4   :  { %s21_s15 = sshll.u32 %s184_s14, 4  ;;  %p161_p0 = scmp.ne.s32.totalorder %s233_s0, %s160_s18  ;;  %s22_s15 = int_to_ptr.vmem [resolvable:$true] %s21_s15 }
   0x5   :  { %p164_p1 = scmp.lt.u32.totalorder %s160_s18, %s233_s0 }
   0x7   :  { %p166_p2 = pnand %p164_p1, %p161_p0 }
   0x9   :  { %169 = shalt.err (!%p166_p2)
}
   0xa   :  { %s170_s2 = scalar_lea.vmem %s22_s15, 1024  ;;  %p175_p4 = scmp.lt.s32.totalorder %s22_s15, %s22_s15 }
   0xb   :  { %p171_p3 = scmp.ne.s32.totalorder %s22_s15, %s170_s2  ;;  %p176_p5 = scmp.lt.s32.totalorder %s170_s2, %s170_s2 }
   0xd   :  { %p177_p6 = por %p176_p5, %p175_p4 }
   0xf   :  { %p178_p7 = pnand %p177_p6, %p171_p3 }
  0x11   :  { %181 = shalt.err (!%p178_p7)
}
  0x12   :  { %s185_s23 = smov 128   ;;  %s186_s24 = smov 8  }
  0x13   :  { %27 = dma.hbm_to_vmem [thread:$0]  %s233_s0, 1024, %s22_s15, [#allocation8], %s185_s23, %s185_s23, %s186_s24  }
  0x14   :  { %182 = dma.done.wait [#allocation8], 1024  }
  0x15   :  { %183 = vsyncadd [#allocation8], 4294966272  ;;  %v187_v2 = vmov 0.0   ;;  %vm188_vm0 = vmmov 0   ;;  %v37_v3 = vlaneseq  ;;  %v57_v6 = vld [vmem:[#allocation7] sm:$0xff]  ;;  %v58_v7 = vld [vmem:[#allocation7 + $0x8] sm:$0xff] }
  0x16   :  { %134 = vmatprep.subr.bf16.mxu0 %v187_v2  ;;  %150 = vmatprep.mubr.msk.bf16.mxu0 %vm188_vm0, %v187_v2  ;;  %v34_v8 = vld [vmem:[%s234_s1] sm:$0x1]  ;;  %v59_v11 = vld [vmem:[#allocation7 + $0x10] sm:$0xff]  ;;  %v60_v14 = vld [vmem:[#allocation7 + $0x18] sm:$0xff] }
  0x17   :  { %v38_v4 = vshrl.u32 %v37_v3, 7  ;;  %v43_v5 = vand.u32 127, %v37_v3  ;;  %135 = vmatpush3.bf16.msra.mxu0 %v57_v6  ;;  %v35_v9 = vunpack.c.l.bf16 %v34_v8  ;;  %v61_v15 = vld [vmem:[#allocation7 + $0x20] sm:$0xff]  ;;  %v62_v16 = vld [vmem:[#allocation7 + $0x28] sm:$0xff]  ;;  %v63_v17 = vld [vmem:[#allocation7 + $0x30] sm:$0xff] }
  0x18   :  { %136 = vmatprep.subr.bf16.mxu0 %v187_v2  ;;  %v64_v18 = vld [vmem:[#allocation7 + $0x38] sm:$0xff] }
  0x19   :  { %vm40_vm1 = vcmp.lt.s32.totalorder %v38_v4, 2  ;;  %vm45_vm2 = vcmp.lt.s32.totalorder %v43_v5, 57 }
  0x1a   :  { %v41_v10 = vsel %vm40_vm1, %v35_v9, %v9_v1 }
  0x1b   :  { %137 = vmatpush3.bf16.msra.mxu0 %v58_v7  ;;  %v46_v12 = vsel %vm45_vm2, %v41_v10, %v9_v1 }
  0x1c   :  { %138 = vmatprep.subr.bf16.mxu0 %v187_v2  ;;  %v123_v13 = vpack.c.bf16 %v9_v1, %v46_v12 }
  0x1e   :  { %124 = vst [vmem:[#allocation9] sm:$0xff] %v123_v13  }
  0x1f   :  { %139 = vmatpush3.bf16.msra.mxu0 %v59_v11 }
  0x20   :  { %140 = vmatprep.subr.bf16.mxu0 %v187_v2 }
  0x23   :  { %141 = vmatpush3.bf16.msra.mxu0 %v60_v14 }
  0x24   :  { %142 = vmatprep.subr.bf16.mxu0 %v187_v2 }
  0x25   :  { %v159_v19 = vld [vmem:[#allocation9] sm:$0xff]  }
  0x27   :  { %143 = vmatpush3.bf16.msra.mxu0 %v61_v15 }
  0x28   :  { %144 = vmatprep.subr.bf16.mxu0 %v187_v2 }
  0x2b   :  { %145 = vmatpush3.bf16.msra.mxu0 %v62_v16 }
  0x2c   :  { %146 = vmatprep.subr.bf16.mxu0 %v187_v2 }
  0x2f   :  { %147 = vmatpush3.bf16.msra.mxu0 %v63_v17 }
  0x30   :  { %148 = vmatprep.subr.bf16.mxu0 %v187_v2 }
  0x33   :  { %149 = vmatpush3.bf16.msra.mxu0 %v64_v18 }
  0x36   :  { %151 = vmatmul.mubr.bf16.vlgmr.msra.gmra.mrb[0].mxu0 %v159_v19 }
 0x109   :  { %v105_v20 = vpop.f32.mrb[0].mxu0 }
 0x10a   :  { %112 = vst [vmem:[%s236_s3] sm:$0xff] %v105_v20  ;;  %v152_v21 = vpop.f32.mrb[1].mxu0 }
 0x10b   :  { %v108_v22 = vpop.f32.mrb[2].mxu0 }
 0x10c   :  { %113 = vst [vmem:[%s236_s3 + $0x8] sm:$0xff] %v108_v22  ;;  %v153_v23 = vpop.f32.mrb[3].mxu0 }
 0x10d   :  { %118 = vsyncpa [#allocation8], 1 }

</bundles_post_ra>
